<compile_context>
chip_gen: v6e
topology: v6e:2x2x1
jax: 0.10.0
libtpu: 0.0.40
codegen_flags: <defaults>
</compile_context>

<pallas_src>
import functools

import jax
import jax.numpy as jnp
from jax.experimental import pallas as pl
from jax.experimental.pallas import tpu as pltpu


_LANES = 128
_TARGET_BLOCK_ROWS = 512  # ~256 KiB per stream per step in f32


def _cdiv(a, b):
    return (a + b - 1) // b


def _round_up(a, b):
    return _cdiv(a, b) * b


def _make_head_kernel(process_log_std, log_std_bounds):
    """Kernel closure; the log-std processing mode is static (trace-time)."""

    def kernel(loc_ref, log_std_ref, std_ref, mean_ref):
        loc = loc_ref[...]          # [block_rows, 128] lane-dense tile
        log_std = log_std_ref[...]  # [block_rows, 128] lane-dense tile

        if process_log_std == "exp_ln":  # literal string from the torch code
            pos = log_std > 0
            # exp only ever sees values <= 0 (no overflow, no inf*0 NaN).
            below = jnp.exp(jnp.where(pos, jnp.zeros_like(log_std), log_std))
            above = jnp.log1p(jnp.where(pos, log_std, jnp.zeros_like(log_std)) + 1e-06) + 1.0
            std = jnp.where(pos, above, below)
        elif process_log_std == "scale":
            ls = jnp.tanh(log_std)
            lo, hi = log_std_bounds
            std = jnp.exp(lo + 0.5 * (hi - lo) * (ls + 1.0))
        elif process_log_std == "clip":
            std = jnp.exp(jnp.clip(log_std, log_std_bounds[0], log_std_bounds[1]))
        else:
            # 'none' / None / 'expln' (the torch typo path): plain exp.
            std = jnp.exp(log_std)

        std_ref[...] = std.astype(std_ref.dtype)
        mean_ref[...] = jnp.tanh(loc).astype(mean_ref.dtype)

    return kernel


@functools.partial(jax.jit, static_argnames=("process_log_std", "log_std_bounds"))
def squashed_gaussian_head(
    x,
    *,
    process_log_std="expln",
    log_std_bounds=(-10.0, 2.0),
):
    """Returns (loc, std, dist_mean) — the tensors defining the SquashedGaussian.

    x: [..., 2*A] float array (last dim is chunked into mean / log_std).
    """
    assert x.shape[-1] % 2 == 0, x.shape
    a_dim = x.shape[-1] // 2
    out_shape = x.shape[:-1] + (a_dim,)
    dtype = x.dtype

    # Split the halves in the wrapper; loc is returned as-is (no kernel copy).
    loc = x[..., :a_dim]
    log_std = x[..., a_dim:]

    # Repack each half into a lane-dense [rows, 128] slab, padded so that the
    # row count is an exact multiple of the block size (pad value 0 is safe
    # for every branch: exp(0)=1, tanh(0)=0; padded rows are sliced away).
    n = int(loc.size)
    rows = max(_cdiv(n, _LANES), 1)
    if rows <= _TARGET_BLOCK_ROWS:
        block_rows = _round_up(rows, 8)          # (8, 128) tiling constraint
    else:
        block_rows = _TARGET_BLOCK_ROWS
    rows_pad = _round_up(rows, block_rows)
    n_pad = rows_pad * _LANES

    def to_slab(a):
        flat = a.reshape(-1)
        flat = jnp.pad(flat, (0, n_pad - n))
        return flat.reshape(rows_pad, _LANES)

    loc2d = to_slab(loc)
    ls2d = to_slab(log_std)

    kernel = _make_head_kernel(process_log_std, log_std_bounds)
    slab_sds = jax.ShapeDtypeStruct((rows_pad, _LANES), dtype)
    spec = pl.BlockSpec((block_rows, _LANES), lambda i: (i, 0))

    std2d, mean2d = pl.pallas_call(
        kernel,
        out_shape=(slab_sds, slab_sds),
        grid=(rows_pad // block_rows,),
        in_specs=[spec, spec],
        out_specs=(spec, spec),
        compiler_params=pltpu.CompilerParams(
            dimension_semantics=("parallel",),   # megacore split on v7x
        ),
    )(loc2d, ls2d)

    std = std2d.reshape(-1)[:n].reshape(out_shape)
    mean = mean2d.reshape(-1)[:n].reshape(out_shape)
    return loc, std, mean


def _reference(x, process_log_std="expln", log_std_bounds=(-10.0, 2.0)):
    a_dim = x.shape[-1] // 2
    loc, log_std = x[..., :a_dim], x[..., a_dim:]
    if process_log_std == "exp_ln":
        pos = log_std > 0
        below = jnp.exp(jnp.where(pos, 0.0, log_std))
        above = jnp.log1p(jnp.where(pos, log_std, 0.0) + 1e-06) + 1.0
        std = jnp.where(pos, above, below)
    elif process_log_std == "scale":
        ls = jnp.tanh(log_std)
        lo, hi = log_std_bounds
        std = jnp.exp(lo + 0.5 * (hi - lo) * (ls + 1.0))
    elif process_log_std == "clip":
        std = jnp.exp(jnp.clip(log_std, *log_std_bounds))
    else:
        std = jnp.exp(log_std)
    return loc, std, jnp.tanh(loc)


if __name__ == "__main__":
    # Small shapes consistent with the head: batch=2, seq=8, action_dim=8
    # -> network output feature dim = 2 * action_dim = 16.
    B, T, A = 2, 8, 8
    key = jax.random.PRNGKey(0)
    x = jax.random.normal(key, (B, T, 2 * A), dtype=jnp.float32)

    ok = True
    for mode in ("expln", "exp_ln", "scale", "clip", "none"):
        loc, std, mean = squashed_gaussian_head(x, process_log_std=mode)
        jax.block_until_ready((loc, std, mean))
        r_loc, r_std, r_mean = _reference(x, process_log_std=mode)
        ok &= bool(jnp.allclose(loc, r_loc, atol=1e-6))
        ok &= bool(jnp.allclose(std, r_std, atol=1e-5, rtol=1e-5))
        ok &= bool(jnp.allclose(mean, r_mean, atol=1e-6))
        ok &= loc.shape == (B, T, A) and std.shape == (B, T, A) and mean.shape == (B, T, A)

    if ok:
        print("KERNEL_OK")
    else:
        raise SystemExit("mismatch vs reference")
</pallas_src>

<mosaic_0001>
module attributes {stable_mosaic.version = 11 : i64} {
  func.func @kernel(%arg0: i32, %arg1: memref<8x128xf32, #tpu.memory_space<vmem>>, %arg2: memref<8x128xf32, #tpu.memory_space<vmem>>, %arg3: memref<8x128xf32, #tpu.memory_space<vmem>>, %arg4: memref<8x128xf32, #tpu.memory_space<vmem>>) attributes {dimension_semantics = [#tpu.dimension_semantics<parallel>], iteration_bounds = array<i64: 1>, scalar_prefetch = 0 : i64, scratch_operands = 0 : i64, tpu.core_type = #tpu.core_type<tc>, window_params = [{transform_indices = @transform_0, window_bounds = array<i64: 8, 128>}, {transform_indices = @transform_1, window_bounds = array<i64: 8, 128>}, {transform_indices = @transform_2, window_bounds = array<i64: 8, 128>}, {transform_indices = @transform_3, window_bounds = array<i64: 8, 128>}]} {
    %c0 = arith.constant 0 : index
    %c0_0 = arith.constant 0 : index
    %0 = vector.load %arg1[%c0, %c0_0] : memref<8x128xf32, #tpu.memory_space<vmem>>, vector<8x128xf32>
    %c0_1 = arith.constant 0 : index
    %c0_2 = arith.constant 0 : index
    %1 = vector.load %arg2[%c0_1, %c0_2] : memref<8x128xf32, #tpu.memory_space<vmem>>, vector<8x128xf32>
    %2 = math.exp %1 : vector<8x128xf32>
    %c0_3 = arith.constant 0 : index
    %c0_4 = arith.constant 0 : index
    %3 = vector.load %arg3[%c0_3, %c0_4] : memref<8x128xf32, #tpu.memory_space<vmem>>, vector<8x128xf32>
    tpu.vector_store %arg3[%c0_3, %c0_4], %2 {strides = array<i32>} : memref<8x128xf32, #tpu.memory_space<vmem>>, vector<8x128xf32>,
    %4 = math.tanh %0 : vector<8x128xf32>
    %c0_5 = arith.constant 0 : index
    %c0_6 = arith.constant 0 : index
    %5 = vector.load %arg4[%c0_5, %c0_6] : memref<8x128xf32, #tpu.memory_space<vmem>>, vector<8x128xf32>
    tpu.vector_store %arg4[%c0_5, %c0_6], %4 {strides = array<i32>} : memref<8x128xf32, #tpu.memory_space<vmem>>, vector<8x128xf32>,
    return
  }
  func.func @transform_0(%arg0: i32) -> (i32, i32) {
    %c0_i32 = arith.constant 0 : i32
    %c0_i32_0 = arith.constant 0 : i32
    return %arg0, %c0_i32 : i32, i32
  }
  func.func @transform_1(%arg0: i32) -> (i32, i32) {
    %c0_i32 = arith.constant 0 : i32
    %c0_i32_0 = arith.constant 0 : i32
    return %arg0, %c0_i32 : i32, i32
  }
  func.func @transform_2(%arg0: i32) -> (i32, i32) {
    %c0_i32 = arith.constant 0 : i32
    %c0_i32_0 = arith.constant 0 : i32
    return %arg0, %c0_i32 : i32, i32
  }
  func.func @transform_3(%arg0: i32) -> (i32, i32) {
    %c0_i32 = arith.constant 0 : i32
    %c0_i32_0 = arith.constant 0 : i32
    return %arg0, %c0_i32 : i32, i32
  }
}

</mosaic_0001>

<bundles_post_ra>
// kernel: squashed_gaussian_head.1
= control target key start
LH: loop header
LB: loop body
LE: loop exit
PB: predicated region body
PF: predicated region fallthrough
CT: control target
= control target key end

     0   :  { %s64_s1 = inlined_call_operand.vmem [shape: f32[8,128], index: 1, kind: input, shape index: {}]   ;;  %s65_s0 = inlined_call_operand.vmem [shape: f32[8,128], index: 0, kind: input, shape index: {}]   ;;  %s66_s3 = inlined_call_operand.vmem [shape: f32[8,128], index: 3, kind: output, shape index: {1}]   ;;  %s67_s2 = inlined_call_operand.vmem [shape: f32[8,128], index: 2, kind: output, shape index: {0}]  }
   0x1   :  { %v14_v0 = vld [vmem:[%s64_s1] sm:$0xff] }
   0x2   :  { %v13_v1 = vld [vmem:[%s65_s0] sm:$0xff]  ;;  %v15_v2 = vmul.f32 1.442695, %v14_v0 }
   0x3   :  { %28 = vtanh.f32 %v13_v1 }
   0x4   :  { %30 = vpow2.f32 %v15_v2 }
  0x10   :  { %v29_v3 = vpop.eup %28 }
  0x11   :  { %19 = vst [vmem:[%s66_s3] sm:$0xff] %v29_v3  ;;  %v31_v4 = vpop.eup %30 }
  0x12   :  { %17 = vst [vmem:[%s67_s2] sm:$0xff] %v31_v4 }

</bundles_post_ra>
